<compile_context>
chip_gen: v7x
topology: tpu7x:2x2x1
jax: 0.10.0
libtpu: 0.0.40
codegen_flags: <defaults>
</compile_context>

<pallas_src>
import jax
import jax.numpy as jnp
from jax.experimental import pallas as pl
from jax.experimental.pallas import tpu as pltpu


def _round_up(x, m):
    return ((x + m - 1) // m) * m


def _round_down(x, m):
    return (x // m) * m


def _lateral_1x1_kernel(w_ref, x_ref, b_ref, o_ref):
    # w_ref: (Cout, Cin)  resident weight (same dtype as x)
    # x_ref: (Cin, T)     pixel tile of the current batch element (lane axis = pixels)
    # b_ref: (Cout, 1)    f32 bias
    # o_ref: (Cout, T)    output tile
    acc = jnp.dot(w_ref[...], x_ref[...], preferred_element_type=jnp.float32)
    o_ref[...] = (acc + b_ref[...]).astype(o_ref.dtype)


def _choose_tile_hw(hw, cin, in_itemsize, n):
    """Pixel-tile width: ~4 MiB of input per tile, multiple of 128, <= 16384 cols."""
    desired = (4 * 2 ** 20) // max(cin * in_itemsize, 1)
    desired = max(128, min(_round_down(desired, 128), 16384))
    if n == 1 and hw >= 256:
        # Guarantee >= 2 pixel tiles so both TensorCores (v7x) get work when N == 1.
        half = _round_up(-(-hw // 2), 128)
        desired = min(desired, half)
    if hw <= desired:
        return hw          # single full-extent block (full-dim escape of the 128 rule)
    return desired         # multiple of 128; ragged last block handled by cdiv grid


def lateral_conv_1x1(x_nchw, weight, bias):
    """1x1 conv (conv + bias) on an NCHW tensor via a Pallas channel-matmul kernel.

    x_nchw : (N, Cin, H, W)   activations (f32 or bf16 -- streamed as-is, no extra cast pass)
    weight : (Cout, Cin)      squeezed 1x1 conv weight
    bias   : (Cout,)
    returns: (N, Cout, H, W), dtype of x_nchw.
    """
    n, cin, h, w_sp = x_nchw.shape
    cout = weight.shape[0]
    hw = h * w_sp

    out_dtype = x_nchw.dtype
    in_itemsize = jnp.dtype(x_nchw.dtype).itemsize
    out_itemsize = jnp.dtype(out_dtype).itemsize

    # Free view -- no transpose, no data movement.
    x3 = x_nchw.reshape(n, cin, hw)

    # Tiny resident operands; casting the weight to the activation dtype is
    # negligible (Cout*Cin elements) and keeps the MXU inputs matched.
    w_mat = weight.astype(x_nchw.dtype)             # (Cout, Cin)
    b_mat = bias.reshape(cout, 1).astype(jnp.float32)

    tile_hw = _choose_tile_hw(hw, cin, in_itemsize, n)
    n_tiles = pl.cdiv(hw, tile_hw)
    grid = (n, n_tiles)

    # Advisory cost: bytes >> flops (memory-bound).
    bytes_accessed = (n * cin * hw * in_itemsize
                      + cout * cin * in_itemsize + cout * 4
                      + n * cout * hw * out_itemsize)
    cost = pl.CostEstimate(flops=2 * n * hw * cin * cout,
                           transcendentals=0,
                           bytes_accessed=int(bytes_accessed))

    # VMEM budget: double-buffered x/out tiles + resident weight/bias + headroom,
    # clamped to 48 MiB (safe within v7x's 64 MiB per-TC VMEM).
    block_bytes = (2 * tile_hw * (cin * in_itemsize + cout * out_itemsize)
                   + cout * cin * in_itemsize + cout * 4)
    vmem_limit = int(min(max(block_bytes + block_bytes // 4 + (1 << 20), 8 * 2 ** 20),
                         48 * 2 ** 20))

    out3 = pl.pallas_call(
        _lateral_1x1_kernel,
        out_shape=jax.ShapeDtypeStruct((n, cout, hw), out_dtype),
        grid_spec=pltpu.PrefetchScalarGridSpec(
            num_scalar_prefetch=0,
            grid=grid,
            in_specs=[
                pl.BlockSpec((cout, cin), lambda b, j: (0, 0)),              # weight (resident)
                pl.BlockSpec((None, cin, tile_hw), lambda b, j: (b, 0, j)),  # x pixel tile
                pl.BlockSpec((cout, 1), lambda b, j: (0, 0)),                # bias (resident)
            ],
            out_specs=pl.BlockSpec((None, cout, tile_hw), lambda b, j: (b, 0, j)),
        ),
        compiler_params=pltpu.CompilerParams(
            dimension_semantics=("parallel", "parallel"),
            vmem_limit_bytes=vmem_limit),
        cost_estimate=cost,
    )(w_mat, x3, b_mat)

    return out3.reshape(n, cout, h, w_sp)


class SingleConnectPallas:
    """JAX/Pallas port of mmdet Single_Connect (conv_cfg/norm_cfg/activation = None)."""

    def __init__(self, in_channels, out_channels, out_blocks=(5,), key=None):
        assert isinstance(in_channels, (list, tuple))
        self.index = [i - 2 for i in out_blocks]
        self.out_channels = out_channels
        key = jax.random.PRNGKey(0) if key is None else key
        self.weights = []
        self.biases = []
        for idx in self.index:
            cin = in_channels[idx]
            key, wk = jax.random.split(key)
            # xavier uniform (gain=1) for a 1x1 conv: fan_in=cin, fan_out=out_channels
            limit = (6.0 / (cin + out_channels)) ** 0.5
            w = jax.random.uniform(wk, (out_channels, cin), jnp.float32,
                                   minval=-limit, maxval=limit)
            b = jnp.zeros((out_channels,), jnp.float32)
            self.weights.append(w)
            self.biases.append(b)

    def __call__(self, inputs):
        outs = [
            lateral_conv_1x1(inputs[self.index[i]], self.weights[i], self.biases[i])
            for i in range(len(self.index))
        ]
        return tuple(outs)


if __name__ == "__main__":
    key = jax.random.PRNGKey(0)
    in_channels = [4, 8, 16, 32]   # feature pyramid channel counts
    out_channels = 8
    # FPN-style levels, NCHW, decreasing (odd) spatial sizes. out_blocks=[5] -> index 3.
    shapes = [(2, 4, 40, 40), (2, 8, 20, 20), (2, 16, 10, 10), (2, 32, 5, 5)]
    keys = jax.random.split(key, len(shapes) + 2)
    inputs = [jax.random.normal(keys[i], s, jnp.float32) for i, s in enumerate(shapes)]

    # Module as specified: out_blocks=[5] -> single lateral 1x1 conv on inputs[3].
    neck = SingleConnectPallas(in_channels, out_channels, out_blocks=[5], key=keys[-2])
    outs = jax.block_until_ready(neck(inputs))
    assert len(outs) == 1 and outs[0].shape == (2, out_channels, 5, 5)
    x = inputs[3]
    ref = jnp.einsum("nchw,oc->nohw", x, neck.weights[0]) + neck.biases[0][None, :, None, None]
    assert jnp.allclose(outs[0], ref, atol=1e-4, rtol=1e-4), "mismatch vs reference (level 3)"

    # Extra coverage: single-batch input large enough to hit the N==1 split and
    # the ragged-last-pixel-tile path (hw=576, tile=384 -> 2 tiles, last partial).
    w2 = jax.random.normal(keys[-1], (out_channels, 16), jnp.float32) * 0.1
    b2 = jnp.arange(out_channels, dtype=jnp.float32) * 0.01
    x2 = jax.random.normal(keys[0], (1, 16, 24, 24), jnp.float32)
    out2 = jax.block_until_ready(lateral_conv_1x1(x2, w2, b2))
    ref2 = jnp.einsum("nchw,oc->nohw", x2, w2) + b2[None, :, None, None]
    assert out2.shape == (1, out_channels, 24, 24)
    assert jnp.allclose(out2, ref2, atol=1e-4, rtol=1e-4), "mismatch vs reference (ragged tile)"

    print("KERNEL_OK")
</pallas_src>

<mosaic_0001>
module attributes {stable_mosaic.version = 11 : i64} {
  func.func @_lateral_1x1_kernel(%arg0: i32, %arg1: i32, %arg2: memref<8x32xf32, #tpu.memory_space<vmem>>, %arg3: memref<1x32x25xf32, #tpu.memory_space<vmem>>, %arg4: memref<8x1xf32, #tpu.memory_space<vmem>>, %arg5: memref<1x8x25xf32, #tpu.memory_space<vmem>>) attributes {dimension_semantics = [#tpu.dimension_semantics<parallel>, #tpu.dimension_semantics<parallel>], iteration_bounds = array<i64: 2, 1>, scalar_prefetch = 0 : i64, scratch_operands = 0 : i64, tpu.core_type = #tpu.core_type<tc>, window_params = [{pipeline_mode = #tpu.pipeline_mode<synchronous>, transform_indices = @transform_0, window_bounds = array<i64: 8, 32>}, {transform_indices = @transform_1, window_bounds = array<i64: 1, 32, 25>}, {pipeline_mode = #tpu.pipeline_mode<synchronous>, transform_indices = @transform_2, window_bounds = array<i64: 8, 1>}, {transform_indices = @transform_3, window_bounds = array<i64: 1, 8, 25>}]} {
    %c0 = arith.constant 0 : index
    %c0_0 = arith.constant 0 : index
    %0 = vector.load %arg2[%c0, %c0_0] : memref<8x32xf32, #tpu.memory_space<vmem>>, vector<8x32xf32>
    %c0_1 = arith.constant 0 : index
    %c0_2 = arith.constant 0 : index
    %c0_3 = arith.constant 0 : index
    %1 = vector.load %arg3[%c0_1, %c0_2, %c0_3] : memref<1x32x25xf32, #tpu.memory_space<vmem>>, vector<1x32x25xf32>
    %2 = vector.shape_cast %1 : vector<1x32x25xf32> to vector<32x25xf32>
    %cst = arith.constant dense<0.000000e+00> : vector<8x25xf32>
    %3 = tpu.matmul %0, %2, %cst {dimension_numbers = #tpu.dot_dimension_numbers<[1], [0], [0], [1], [0, 0, 1, 1], [], []>} : vector<8x32xf32>, vector<32x25xf32>, vector<8x25xf32> -> vector<8x25xf32>
    %c0_4 = arith.constant 0 : index
    %c0_5 = arith.constant 0 : index
    %4 = vector.load %arg4[%c0_4, %c0_5] : memref<8x1xf32, #tpu.memory_space<vmem>>, vector<8x1xf32>
    %5 = vector.broadcast %4 : vector<8x1xf32> to vector<8x25xf32>
    %6 = arith.addf %3, %5 : vector<8x25xf32>
    %c0_6 = arith.constant 0 : index
    %c0_7 = arith.constant 0 : index
    %c0_8 = arith.constant 0 : index
    %7 = vector.load %arg5[%c0_6, %c0_7, %c0_8] : memref<1x8x25xf32, #tpu.memory_space<vmem>>, vector<1x8x25xf32>
    %8 = vector.shape_cast %7 : vector<1x8x25xf32> to vector<8x25xf32>
    %9 = vector.shape_cast %6 : vector<8x25xf32> to vector<1x8x25xf32>
    tpu.vector_store %arg5[%c0_6, %c0_7, %c0_8], %9 {strides = array<i32>} : memref<1x8x25xf32, #tpu.memory_space<vmem>>, vector<1x8x25xf32>,
    return
  }
  func.func @transform_0(%arg0: i32, %arg1: i32) -> (i32, i32) {
    %c0_i32 = arith.constant 0 : i32
    %c0_i32_0 = arith.constant 0 : i32
    %c0_i32_1 = arith.constant 0 : i32
    return %c0_i32, %c0_i32_0 : i32, i32
  }
  func.func @transform_1(%arg0: i32, %arg1: i32) -> (i32, i32, i32) {
    %c0_i32 = arith.constant 0 : i32
    %c0_i32_0 = arith.constant 0 : i32
    return %arg0, %c0_i32, %arg1 : i32, i32, i32
  }
  func.func @transform_2(%arg0: i32, %arg1: i32) -> (i32, i32) {
    %c0_i32 = arith.constant 0 : i32
    %c0_i32_0 = arith.constant 0 : i32
    %c0_i32_1 = arith.constant 0 : i32
    return %c0_i32, %c0_i32_0 : i32, i32
  }
  func.func @transform_3(%arg0: i32, %arg1: i32) -> (i32, i32, i32) {
    %c0_i32 = arith.constant 0 : i32
    %c0_i32_0 = arith.constant 0 : i32
    return %arg0, %c0_i32, %arg1 : i32, i32, i32
  }
}

</mosaic_0001>

<bundles_post_ra>
// kernel: tpu_custom_call.1
= control target key start
LH: loop header
LB: loop body
LE: loop exit
PB: predicated region body
PF: predicated region fallthrough
CT: control target
= control target key end

     0   :  { %8 = vsyncpa [#allocation3], 0  ;;  %s689_s0 = inlined_call_operand.vmem [shape: f32[8,32], index: 0, kind: input, shape index: {}]   ;;  %s690_s1 = inlined_call_operand.vmem [shape: f32[2,32,25], index: 1, kind: input, shape index: {}]   ;;  %s691_s2 = inlined_call_operand.vmem [shape: f32[8,1], index: 2, kind: input, shape index: {}]   ;;  %s692_s3 = inlined_call_operand.hbm [shape: f32[2,8,25], index: 3, kind: output, shape index: {}]  }
   0x1   :  { %10 = vsyncpa [#allocation3 + $0x1], 0  ;;  %s571_s12 = smov 0   ;;  %s573_s13 = smov 0  }
   0x2   :  { %s575_s14 = smov 0   ;;  %s577_s15 = smov 0  }
   0x3   :  { %s579_s16 = smov 0   ;;  %s581_s17 = smov 0  }
   0x4 LB: > { %s370_s18 = sadd.s32 4294967295, %s544_s17   ;;  %s371_s19 = sadd.s32 4294967294, %s544_s17   ;;  %s544_s17 = sphi %s581_s17, %s16_s17   ;;  %s540_s16 = sphi %s579_s16, %s699_s16   ;;  %s536_s15 = sphi %s577_s15, %s698_s15   ;;  %s532_s14 = sphi %s575_s14, %s697_s14   ;;  %s528_s13 = sphi %s573_s13, %s696_s13   ;;  %s524_s12 = sphi %s571_s12, %s695_s12  }
   0x5   : > { %s28_s20 = sadd.s32 1, %s540_s16  ;;  %s107_s21 = sadd.s32 1, %s532_s14 }
   0x6   : > { %p30_p0 = scmp.ge.s32.totalorder %s28_s20, 2  ;;  %p117_p1 = scmp.ne.s32.totalorder %s532_s14, %s528_s13 }
   0x7   : > { %p118_p2 = scmp.eq.s32.totalorder %s370_s18, 1  ;;  %p123_p3 = scmp.ne.s32.totalorder %s528_s13, %s524_s12 }
   0x8   : > { %s701_s20 = smov (%p30_p0, %s28_s20), 0  ;;  %p124_p5 = scmp.eq.s32.totalorder %s371_s19, 1 }
   0x9   : > { %p611_p4 = por %p118_p2, %p117_p1  ;;  %s102_s23 = ssub.s32 %s540_s16, %s701_s20 }
   0xa   : > { %p374_p6 = scmp.ge.s32.totalorder %s544_s17, 1  ;;  %p105_p7 = scmp.eq.s32.totalorder %s102_s23, 0 }
   0xb   : > { %p618_p8 = por %p124_p5, %p123_p3  ;;  %p159_p9 = scmp.lt.s32.totalorder %s544_s17, 3 }
   0xc   : > { %s624_s25 = scalar_select %p105_p7, %s532_s14, %s107_s21  }
   0xd   : > { %p160_p10 = pnand %p374_p6, %p159_p9 }
   0xe   : > { %p186_p11 = scmp.lt.s32.totalorder (!%p160_p10), %s536_s15, 1  ;;  %v546_v0 = vmov (!%p160_p10), 0.0|0.0   ;;  %vm547_vm0 = vmmov (!%p160_p10), 0   ;;  %v548_v1 = vmov (!%p160_p10), 0.0   ;;  %v199_v2 = vld [vmem:[%s691_s2] sm:$0xff] (!%p160_p10)  ;;  %v549_v3 = vmov (!%p160_p10), 0  }
   0xf   : > { %163 = sbr.rel (%p160_p10) target bundleno = 264 (0x108), region = 32  ;;  %400 = vmatprep.subr.bf16.mxu0 (!%p160_p10), %v546_v0  ;;  %397 = vmatprep.mubr.msk.f32.mxu0 (!%p160_p10), %vm547_vm0, %v548_v1  ;;  %v194_v10 = vld [vmem:[%s689_s0] sm:$0xff] (!%p160_p10)  ;;  %vm205_vm1 = vcmask (!%p160_p10), 261120   ;;  %s183_s8 = sand.u32 (!%p160_p10), 1, %s528_s13   ;;  %vm279_vm2 = vcmask (!%p160_p10), 203776  }
  0x10   : > { %465 = vset.pattern.permute.xlu0 (!%p160_p10), %v549_v3  ;;  %s375_s9 = sshll.u32 (!%p160_p10), %s183_s8, 3  ;;  %s380_s10 = sshll.u32 (!%p160_p10), %s536_s15, 7 }
  0x11   : > { %202 = vperm.xlu0 (!%p160_p10), %465, %v199_v2   ;;  %s185_s11 = scalar_lea.vmem (!%p160_p10), [#allocation2], %s375_s9  ;;  %s642_s23 = scalar_lea.hbm (!%p160_p10), %s692_s3, %s380_s10 }
  0x12   : > { %s296_s18 = sshll.u32 (!%p160_p10), %s185_s11, 4  ;;  %s282_s26 = scalar_lea.sflag (!%p160_p10), [#allocation3], %s183_s8  ;;  %s644_s18 = int_to_ptr.vmem [resolvable:$true] %s296_s18 }
  0x13   : > { %s466_s27 = scalar_lea.vmem (!%p160_p10), %s644_s18, 128 }
  0x14   : > { %p467_p12 = scmp.ne.s32.totalorder (!%p160_p10), %s644_s18, %s466_s27 }
  0x16   : > { %s187_s28 = scalar_select %p186_p11, %s536_s15, 1 }
  0x17   : > { %p468_p13 = pnand %p467_p12, %p611_p4  ;;  %s550_s15 = smov [#allocation2]  }
  0x18   : > { %s383_s29 = sshll.u32 %s187_s28, 5  ;;  %s470_s28 = sshll.u32 %s550_s15, 4  ;;  %s471_s28 = int_to_ptr.vmem [resolvable:$false] %s470_s28 }
  0x19   : > { %s193_s5 = scalar_lea.vmem %s690_s1, %s383_s29  ;;  %p469_p0 = pneg %p468_p13 }
  0x1a   : > { %v195_v4 = vld [vmem:[%s193_s5] sm:$0xff]  ;;  %v196_v5 = vld [vmem:[%s193_s5 + $0x8] sm:$0xff]  ;;  %v197_v6 = vld [vmem:[%s193_s5 + $0x10] sm:$0xff]  ;;  %s472_s29 = scalar_lea.vmem %s471_s28, 256  ;;  %p473_p1 = scmp.lt.s32.totalorder %s644_s18, %s471_s28 }
  0x1b   : > { %v401_v7 = vpack.c.bf16 %v196_v5, %v195_v4  ;;  %v198_v8 = vld [vmem:[%s193_s5 + $0x18] sm:$0xff]  ;;  %p474_p2 = scmp.lt.s32.totalorder %s472_s29, %s466_s27 }
  0x1c   : > { %v404_v9 = vpack.c.bf16 %v198_v8, %v197_v6 }
  0x1d   : > { %402 = vmatpush3.bf16.msra.mxu0 %v401_v7  ;;  %p475_p3 = por %p474_p2, %p473_p1 }
  0x1e   : > { %403 = vmatprep.subr.bf16.mxu0 %v546_v0 }
  0x1f   : > { %p476_p5 = pnand %p475_p3, %p469_p0 }
  0x21   : > { %405 = vmatpush3.bf16.msra.mxu0 %v404_v9 }
  0x24   : > { %398 = vmatmul.mubr.msk.f32.vlgmr.msra.gmra.mrb[0].mxu0 %vm205_vm1, %v194_v10 }
  0x90   : > { %v203_v11 = vpop.permute.xlu0 %202 }
  0xf7   : > { %v275_v12 = vpop.f32.mrb[0].mxu0 }
  0xf8   : > { %v276_v13 = vadd.f32 %v275_v12, %v203_v11  ;;  %v399_v14 = vpop.f32.mrb[1].mxu0 }
  0xfa   : > { %280 = vst.msk [vmem:[%s185_s11] sm:$0xff] %vm279_vm2, %v276_v13 }
  0xfb   : > { %479 = shalt.err (!%p476_p5)
}
  0xfc   : > { %s480_s30 = scalar_lea.hbm %s642_s23, 128  ;;  %s484_s6 = scalar_lea.hbm %s692_s3, 256 }
  0xfd   : > { %p481_p6 = scmp.ne.s32.totalorder %s642_s23, %s480_s30  ;;  %p485_p10 = scmp.lt.u32.totalorder %s642_s23, %s692_s3 }
  0xfe   : > { %p486_p11 = scmp.lt.u32.totalorder %s484_s6, %s480_s30  ;;  %p488_p13 = scmp.lt.u32.totalorder %s480_s30, %s642_s23 }
  0xff   : > { %p482_p7 = pnand %p481_p6, %p611_p4 }
 0x100   : > { %p487_p12 = por %p486_p11, %p485_p10 }
 0x101   : > { %p483_p9 = pneg %p482_p7 }
 0x102   : > { %p489_p0 = por %p488_p13, %p487_p12 }
 0x104   : > { %p490_p1 = pnand %p489_p0, %p483_p9 }
 0x106   : > { %493 = shalt.err (!%p490_p1)
}
 0x107   : > { %406 = dma.vmem_to_hbm [thread:$0]  (%p611_p4), %s644_s18, 128, %s642_s23, %s282_s26  }
 0x108 PF: > { %p412_p2 = scmp.ge.s32.totalorder %s544_s17, 2  ;;  %s308_s9 = sand.u32 1, %s524_s12  }
 0x109   : > { %s309_s10 = scalar_lea.sflag [#allocation3], %s308_s9 }
 0x10a   : > { %p409_p3 = pnand %p412_p2, %p618_p8 }
 0x10c   : > { %519 = dma.done.wait (!%p409_p3), %s309_s10, 128  }
 0x10d   : > { %521 = vsyncadd (!%p409_p3), %s309_s10, 4294967168  ;;  %s16_s17 = sadd.s32 1, %s544_s17   ;;  %s695_s12 = smov %s528_s13 }
 0x10e   : > { %p13_p5 = scmp.ge.s32.totalorder %s16_s17, 4   ;;  %s696_s13 = smov %s532_s14 }
 0x10f   : > { %s697_s14 = smov %s624_s25  ;;  %s698_s15 = smov %s540_s16 }
 0x110   : > { %s699_s16 = smov %s701_s20  ;;  %15 = sbr.rel (!%p13_p5) target bundleno = 4 (0x4), region = 67 }
 0x117   :  { %314 = vsyncpa [#allocation3], 1 }
 0x118   :  { %316 = vsyncpa [#allocation3 + $0x1], 1 }

</bundles_post_ra>
